<compile_context>
chip_gen: v6e
topology: v6e:2x2x1
jax: 0.10.0
libtpu: 0.0.40
codegen_flags: <defaults>
</compile_context>

<pallas_src>
from functools import partial

import jax
import jax.numpy as jnp
from jax.experimental import pallas as pl
from jax.experimental.pallas import tpu as pltpu

EPS = 1e-5                       # nn.LayerNorm default
MATMUL_DTYPE = jnp.bfloat16      # MXU input dtype (f32 accumulation everywhere)
_VMEM_LIMIT_BYTES = 64 * 1024 * 1024   # raise scoped-VMEM cap (<= v7x physical)


# ----------------------------- Pallas kernels ------------------------------

def _attn_block_kernel(x_ref, wqkv_ref, bqkv_ref, wo_ref, bo_ref, g_ref, b_ref,
                       o_ref, *maybe_attn_ref, n_heads, scale):
    """One batch element: fused QKV proj + MHA + out proj + residual + LN1.

    x_ref:    (1, L, D)      input tokens (residual kept in f32)
    wqkv_ref: (D, 3D)        fused Q|K|V projection weights (bf16)
    wo_ref:   (D, D)         output projection weights (bf16)
    o_ref:    (1, L, D)      LayerNorm1(x + attention(x))
    maybe_attn_ref: optional (1, H, L, L) softmax attention weights
    """
    attn_ref = maybe_attn_ref[0] if maybe_attn_ref else None

    x = x_ref[0].astype(jnp.float32)                     # [L, D] (residual path)
    L, D = x.shape
    dh = D // n_heads

    # Fused QKV projection: one lane-dense [L, 3D] matmul on the MXU.
    xc = x.astype(wqkv_ref.dtype)
    qkv = (jnp.dot(xc, wqkv_ref[...], preferred_element_type=jnp.float32)
           + bqkv_ref[...])                              # [L, 3D] f32

    # Per-head attention; heads are split with static slices inside the kernel
    # (no XLA-level reshape/transpose of activations through HBM).
    ctx_heads = []
    for h in range(n_heads):
        q_h = qkv[:, h * dh:(h + 1) * dh]
        k_h = qkv[:, D + h * dh: D + (h + 1) * dh]
        v_h = qkv[:, 2 * D + h * dh: 2 * D + (h + 1) * dh]

        # dot_general contracting the shared last dim: no explicit k.T copy.
        s = jax.lax.dot_general(
            q_h.astype(MATMUL_DTYPE), k_h.astype(MATMUL_DTYPE),
            dimension_numbers=(((1,), (1,)), ((), ())),
            preferred_element_type=jnp.float32) * scale   # [L, L] f32

        m = jnp.max(s, axis=-1, keepdims=True)
        p = jnp.exp(s - m)
        denom = jnp.sum(p, axis=-1, keepdims=True)
        a = p * pl.reciprocal(denom, approx=True)         # softmax (f32, EUP recip)

        if attn_ref is not None:
            attn_ref[0, h] = a.astype(attn_ref.dtype)

        ctx_heads.append(
            jnp.dot(a.astype(MATMUL_DTYPE), v_h.astype(MATMUL_DTYPE),
                    preferred_element_type=jnp.float32))  # [L, dh] f32

    ctx = jnp.concatenate(ctx_heads, axis=-1)             # [L, D] f32

    # Output projection + residual + LayerNorm1 (stats in f32).
    new_x = (jnp.dot(ctx.astype(wo_ref.dtype), wo_ref[...],
                     preferred_element_type=jnp.float32) + bo_ref[...])
    z = x + new_x                                          # dropout == identity
    mu = jnp.mean(z, axis=-1, keepdims=True)
    var = jnp.mean((z - mu) ** 2, axis=-1, keepdims=True)
    zn = (z - mu) * jax.lax.rsqrt(var + EPS)
    o_ref[0] = (zn * g_ref[...] + b_ref[...]).astype(o_ref.dtype)


def _ffn_ln_kernel(x_ref, w1_ref, b1_ref, w2_ref, b2_ref, g_ref, b_ref, o_ref):
    """Row tile of tokens: y = relu(x@W1 + b1)@W2 + b2 ; o = LayerNorm(x + y)."""
    x = x_ref[...].astype(jnp.float32)                    # [TILE_N, D]
    h = (jnp.dot(x.astype(w1_ref.dtype), w1_ref[...],
                 preferred_element_type=jnp.float32) + b1_ref[...])
    h = jnp.maximum(h, 0.0)                               # activation='relu'
    y = (jnp.dot(h.astype(w2_ref.dtype), w2_ref[...],
                 preferred_element_type=jnp.float32) + b2_ref[...])
    z = x + y                                             # dropout == identity
    mu = jnp.mean(z, axis=-1, keepdims=True)
    var = jnp.mean((z - mu) ** 2, axis=-1, keepdims=True)
    zn = (z - mu) * jax.lax.rsqrt(var + EPS)
    o_ref[...] = (zn * g_ref[...] + b_ref[...]).astype(o_ref.dtype)


# ------------------------------ wrappers ------------------------------------

def _row_tile(n, max_tile=256):
    """Pick a row (token) tile: multiple of 8 sublanes, prefer exact divisor.

    max_tile=256 keeps the fused FFN tile (x, h=[tile,d_ff] f32, W1, W2, double
    buffers) well inside v7x's 64 MiB VMEM; v5e/v6e have more headroom.
    """
    if n <= max_tile:
        return n
    t = (max_tile // 8) * 8
    while t >= 8:
        if n % t == 0:
            return t
        t -= 8
    # No clean divisor: use a ragged last block (Pallas pads reads / masks
    # writes outside the array bounds; rows are independent here).
    return (max_tile // 8) * 8


def attention_block(x, wqkv, bqkv, wo, bo, gamma, beta, n_heads,
                    return_attn=True):
    """Fused QKV proj + multi-head attention + out proj + residual + LN1."""
    B, L, D = x.shape
    dh = D // n_heads
    scale = 1.0 / float(dh) ** 0.5

    def resident2d(shape):
        return pl.BlockSpec(shape, lambda b: (0, 0))

    in_specs = [
        pl.BlockSpec((1, L, D), lambda b: (b, 0, 0)),     # x
        resident2d((D, 3 * D)),                           # wqkv (stays in VMEM)
        resident2d((1, 3 * D)),                           # bqkv
        resident2d((D, D)),                               # wo
        resident2d((1, D)),                               # bo
        resident2d((1, D)),                               # ln1 gamma
        resident2d((1, D)),                               # ln1 beta
    ]
    out_specs = [pl.BlockSpec((1, L, D), lambda b: (b, 0, 0))]
    out_shapes = [jax.ShapeDtypeStruct((B, L, D), x.dtype)]
    if return_attn:
        out_specs.append(pl.BlockSpec((1, n_heads, L, L), lambda b: (b, 0, 0, 0)))
        out_shapes.append(jax.ShapeDtypeStruct((B, n_heads, L, L), jnp.float32))

    outs = pl.pallas_call(
        partial(_attn_block_kernel, n_heads=n_heads, scale=scale),
        grid=(B,),
        in_specs=in_specs,
        out_specs=tuple(out_specs),
        out_shape=tuple(out_shapes),
        compiler_params=pltpu.CompilerParams(
            dimension_semantics=("parallel",),           # batch sharded over TCs
            vmem_limit_bytes=_VMEM_LIMIT_BYTES),
    )(x,
      wqkv, bqkv.reshape(1, 3 * D),
      wo, bo.reshape(1, D),
      gamma.reshape(1, D), beta.reshape(1, D))

    if return_attn:
        return outs[0], outs[1]
    return outs[0], None


def ffn_layernorm(x2, w1, b1, w2, b2, gamma, beta, max_tile=256):
    """Fused FFN (two 1x1 convs == Linears) + residual + LayerNorm2, row-tiled."""
    N, D = x2.shape
    d_ff = w1.shape[1]
    tn = _row_tile(N, max_tile)

    return pl.pallas_call(
        _ffn_ln_kernel,
        grid=(pl.cdiv(N, tn),),
        in_specs=[
            pl.BlockSpec((tn, D), lambda i: (i, 0)),      # x tile (pipelined)
            pl.BlockSpec((D, d_ff), lambda i: (0, 0)),    # W1 resident
            pl.BlockSpec((1, d_ff), lambda i: (0, 0)),    # b1
            pl.BlockSpec((d_ff, D), lambda i: (0, 0)),    # W2 resident
            pl.BlockSpec((1, D), lambda i: (0, 0)),       # b2
            pl.BlockSpec((1, D), lambda i: (0, 0)),       # ln2 gamma
            pl.BlockSpec((1, D), lambda i: (0, 0)),       # ln2 beta
        ],
        out_specs=pl.BlockSpec((tn, D), lambda i: (i, 0)),
        out_shape=jax.ShapeDtypeStruct((N, D), x2.dtype),
        compiler_params=pltpu.CompilerParams(
            dimension_semantics=("parallel",),
            vmem_limit_bytes=_VMEM_LIMIT_BYTES),
    )(x2, w1, b1.reshape(1, d_ff), w2, b2.reshape(1, D),
      gamma.reshape(1, D), beta.reshape(1, D))


def encoder_layer_forward(x, params, n_heads, attn_mask=None, return_attn=True):
    """Reproduces EncoderLayer.forward (eval mode): returns (out, attn)."""
    del attn_mask  # FullAttention with mask_flag=False / None mask
    B, L, D = x.shape

    # --- x = norm1(x + dropout(attention(x, x, x))) ---  (single fused kernel)
    x1, attn = attention_block(
        x, params["wqkv"], params["bqkv"], params["wo"], params["bo"],
        params["ln1_g"], params["ln1_b"], n_heads, return_attn=return_attn)

    # --- y = conv2(relu(conv1(x))) ; out = norm2(x + y) ---  (single fused kernel)
    out = ffn_layernorm(
        x1.reshape(B * L, D),
        params["w1"], params["b1"], params["w2"], params["b2"],
        params["ln2_g"], params["ln2_b"])

    return out.reshape(B, L, D), attn


# ------------------------------ params --------------------------------------

def init_params(key, d_model, d_ff, matmul_dtype=MATMUL_DTYPE):
    ks = jax.random.split(key, 6)
    s = 0.02
    f32 = jnp.float32
    wq = s * jax.random.normal(ks[0], (d_model, d_model), f32)
    wk = s * jax.random.normal(ks[1], (d_model, d_model), f32)
    wv = s * jax.random.normal(ks[2], (d_model, d_model), f32)
    return {
        # fused Q|K|V projection: [D, 3D], bf16 for the MXU
        "wqkv": jnp.concatenate([wq, wk, wv], axis=1).astype(matmul_dtype),
        "bqkv": jnp.zeros((3 * d_model,), f32),
        # output projection
        "wo": (s * jax.random.normal(ks[3], (d_model, d_model), f32)).astype(matmul_dtype),
        "bo": jnp.zeros((d_model,), f32),
        # conv1 (kernel_size=1) == Linear(d_model -> d_ff), stored [D, Dff]
        "w1": (s * jax.random.normal(ks[4], (d_model, d_ff), f32)).astype(matmul_dtype),
        "b1": jnp.zeros((d_ff,), f32),
        # conv2 (kernel_size=1) == Linear(d_ff -> d_model), stored [Dff, D]
        "w2": (s * jax.random.normal(ks[5], (d_ff, d_model), f32)).astype(matmul_dtype),
        "b2": jnp.zeros((d_model,), f32),
        # layer norms (f32)
        "ln1_g": jnp.ones((d_model,), f32),
        "ln1_b": jnp.zeros((d_model,), f32),
        "ln2_g": jnp.ones((d_model,), f32),
        "ln2_b": jnp.zeros((d_model,), f32),
    }


# ------------------------------- main ----------------------------------------

if __name__ == "__main__":
    B, L, D, H, D_FF = 2, 8, 32, 4, 64   # batch, tokens (variates), d_model, heads, d_ff

    key = jax.random.PRNGKey(0)
    k_params, k_x = jax.random.split(key)
    params = init_params(k_params, D, D_FF)
    x = jax.random.normal(k_x, (B, L, D), jnp.float32)

    fwd = jax.jit(lambda xx, pp: encoder_layer_forward(xx, pp, n_heads=H))
    out, attn = fwd(x, params)
    jax.block_until_ready((out, attn))

    assert out.shape == (B, L, D)
    assert attn.shape == (B, H, L, L)
    assert jnp.all(jnp.isfinite(out))
    print("KERNEL_OK")
</pallas_src>

<mosaic_0001>
module attributes {stable_mosaic.version = 11 : i64} {
  func.func @_ffn_ln_kernel(%arg0: i32, %arg1: memref<16x32xf32, #tpu.memory_space<vmem>>, %arg2: memref<32x64xbf16, #tpu.memory_space<vmem>>, %arg3: memref<1x64xf32, #tpu.memory_space<vmem>>, %arg4: memref<64x32xbf16, #tpu.memory_space<vmem>>, %arg5: memref<1x32xf32, #tpu.memory_space<vmem>>, %arg6: memref<1x32xf32, #tpu.memory_space<vmem>>, %arg7: memref<1x32xf32, #tpu.memory_space<vmem>>, %arg8: memref<16x32xf32, #tpu.memory_space<vmem>>) attributes {dimension_semantics = [#tpu.dimension_semantics<parallel>], iteration_bounds = array<i64: 1>, scalar_prefetch = 0 : i64, scratch_operands = 0 : i64, tpu.core_type = #tpu.core_type<tc>, window_params = [{transform_indices = @transform_0, window_bounds = array<i64: 16, 32>}, {pipeline_mode = #tpu.pipeline_mode<synchronous>, transform_indices = @transform_1, window_bounds = array<i64: 32, 64>}, {pipeline_mode = #tpu.pipeline_mode<synchronous>, transform_indices = @transform_2, window_bounds = array<i64: 1, 64>}, {pipeline_mode = #tpu.pipeline_mode<synchronous>, transform_indices = @transform_3, window_bounds = array<i64: 64, 32>}, {pipeline_mode = #tpu.pipeline_mode<synchronous>, transform_indices = @transform_4, window_bounds = array<i64: 1, 32>}, {pipeline_mode = #tpu.pipeline_mode<synchronous>, transform_indices = @transform_5, window_bounds = array<i64: 1, 32>}, {pipeline_mode = #tpu.pipeline_mode<synchronous>, transform_indices = @transform_6, window_bounds = array<i64: 1, 32>}, {transform_indices = @transform_7, window_bounds = array<i64: 16, 32>}]} {
    %c0 = arith.constant 0 : index
    %c0_0 = arith.constant 0 : index
    %0 = vector.load %arg1[%c0, %c0_0] : memref<16x32xf32, #tpu.memory_space<vmem>>, vector<16x32xf32>
    %1 = arith.truncf %0 : vector<16x32xf32> to vector<16x32xbf16>
    %c0_1 = arith.constant 0 : index
    %c0_2 = arith.constant 0 : index
    %2 = vector.load %arg2[%c0_1, %c0_2] : memref<32x64xbf16, #tpu.memory_space<vmem>>, vector<32x64xbf16>
    %cst = arith.constant dense<0.000000e+00> : vector<16x64xf32>
    %3 = tpu.matmul %1, %2, %cst {dimension_numbers = #tpu.dot_dimension_numbers<[1], [0], [0], [1], [0, 0, 1, 1], [], []>} : vector<16x32xbf16>, vector<32x64xbf16>, vector<16x64xf32> -> vector<16x64xf32>
    %c0_3 = arith.constant 0 : index
    %c0_4 = arith.constant 0 : index
    %4 = vector.load %arg3[%c0_3, %c0_4] : memref<1x64xf32, #tpu.memory_space<vmem>>, vector<1x64xf32>
    %5 = vector.broadcast %4 : vector<1x64xf32> to vector<16x64xf32>
    %6 = arith.addf %3, %5 : vector<16x64xf32>
    %cst_5 = arith.constant 0.000000e+00 : f32
    %7 = vector.broadcast %cst_5 : f32 to vector<16x64xf32>
    %8 = arith.maximumf %6, %7 : vector<16x64xf32>
    %9 = arith.truncf %8 : vector<16x64xf32> to vector<16x64xbf16>
    %c0_6 = arith.constant 0 : index
    %c0_7 = arith.constant 0 : index
    %10 = vector.load %arg4[%c0_6, %c0_7] : memref<64x32xbf16, #tpu.memory_space<vmem>>, vector<64x32xbf16>
    %cst_8 = arith.constant dense<0.000000e+00> : vector<16x32xf32>
    %11 = tpu.matmul %9, %10, %cst_8 {dimension_numbers = #tpu.dot_dimension_numbers<[1], [0], [0], [1], [0, 0, 1, 1], [], []>} : vector<16x64xbf16>, vector<64x32xbf16>, vector<16x32xf32> -> vector<16x32xf32>
    %c0_9 = arith.constant 0 : index
    %c0_10 = arith.constant 0 : index
    %12 = vector.load %arg5[%c0_9, %c0_10] : memref<1x32xf32, #tpu.memory_space<vmem>>, vector<1x32xf32>
    %13 = vector.broadcast %12 : vector<1x32xf32> to vector<16x32xf32>
    %14 = arith.addf %11, %13 : vector<16x32xf32>
    %15 = arith.addf %0, %14 : vector<16x32xf32>
    %cst_11 = arith.constant dense<0.000000e+00> : vector<16xf32>
    %16 = vector.multi_reduction <add>, %15, %cst_11 [1] : vector<16x32xf32> to vector<16xf32>
    %17 = vector.shape_cast %16 : vector<16xf32> to vector<16x1xf32>
    %cst_12 = arith.constant 3.200000e+01 : f32
    %18 = vector.broadcast %cst_12 : f32 to vector<16x1xf32>
    %19 = arith.divf %17, %18 : vector<16x1xf32>
    %20 = vector.broadcast %19 : vector<16x1xf32> to vector<16x32xf32>
    %21 = arith.subf %15, %20 : vector<16x32xf32>
    %22 = arith.mulf %21, %21 : vector<16x32xf32>
    %cst_13 = arith.constant dense<0.000000e+00> : vector<16xf32>
    %23 = vector.multi_reduction <add>, %22, %cst_13 [1] : vector<16x32xf32> to vector<16xf32>
    %24 = vector.shape_cast %23 : vector<16xf32> to vector<16x1xf32>
    %cst_14 = arith.constant 3.200000e+01 : f32
    %25 = vector.broadcast %cst_14 : f32 to vector<16x1xf32>
    %26 = arith.divf %24, %25 : vector<16x1xf32>
    %27 = vector.broadcast %19 : vector<16x1xf32> to vector<16x32xf32>
    %28 = arith.subf %15, %27 : vector<16x32xf32>
    %cst_15 = arith.constant 9.99999974E-6 : f32
    %29 = vector.broadcast %cst_15 : f32 to vector<16x1xf32>
    %30 = arith.addf %26, %29 : vector<16x1xf32>
    %31 = math.rsqrt %30 : vector<16x1xf32>
    %32 = vector.broadcast %31 : vector<16x1xf32> to vector<16x32xf32>
    %33 = arith.mulf %28, %32 : vector<16x32xf32>
    %c0_16 = arith.constant 0 : index
    %c0_17 = arith.constant 0 : index
    %34 = vector.load %arg6[%c0_16, %c0_17] : memref<1x32xf32, #tpu.memory_space<vmem>>, vector<1x32xf32>
    %35 = vector.broadcast %34 : vector<1x32xf32> to vector<16x32xf32>
    %36 = arith.mulf %33, %35 : vector<16x32xf32>
    %c0_18 = arith.constant 0 : index
    %c0_19 = arith.constant 0 : index
    %37 = vector.load %arg7[%c0_18, %c0_19] : memref<1x32xf32, #tpu.memory_space<vmem>>, vector<1x32xf32>
    %38 = vector.broadcast %37 : vector<1x32xf32> to vector<16x32xf32>
    %39 = arith.addf %36, %38 : vector<16x32xf32>
    %c0_20 = arith.constant 0 : index
    %c0_21 = arith.constant 0 : index
    %40 = vector.load %arg8[%c0_20, %c0_21] : memref<16x32xf32, #tpu.memory_space<vmem>>, vector<16x32xf32>
    tpu.vector_store %arg8[%c0_20, %c0_21], %39 {strides = array<i32>} : memref<16x32xf32, #tpu.memory_space<vmem>>, vector<16x32xf32>,
    return
  }
  func.func @transform_0(%arg0: i32) -> (i32, i32) {
    %c0_i32 = arith.constant 0 : i32
    %c0_i32_0 = arith.constant 0 : i32
    return %arg0, %c0_i32 : i32, i32
  }
  func.func @transform_1(%arg0: i32) -> (i32, i32) {
    %c0_i32 = arith.constant 0 : i32
    %c0_i32_0 = arith.constant 0 : i32
    %c0_i32_1 = arith.constant 0 : i32
    return %c0_i32, %c0_i32_0 : i32, i32
  }
  func.func @transform_2(%arg0: i32) -> (i32, i32) {
    %c0_i32 = arith.constant 0 : i32
    %c0_i32_0 = arith.constant 0 : i32
    %c0_i32_1 = arith.constant 0 : i32
    return %c0_i32, %c0_i32_0 : i32, i32
  }
  func.func @transform_3(%arg0: i32) -> (i32, i32) {
    %c0_i32 = arith.constant 0 : i32
    %c0_i32_0 = arith.constant 0 : i32
    %c0_i32_1 = arith.constant 0 : i32
    return %c0_i32, %c0_i32_0 : i32, i32
  }
  func.func @transform_4(%arg0: i32) -> (i32, i32) {
    %c0_i32 = arith.constant 0 : i32
    %c0_i32_0 = arith.constant 0 : i32
    %c0_i32_1 = arith.constant 0 : i32
    return %c0_i32, %c0_i32_0 : i32, i32
  }
  func.func @transform_5(%arg0: i32) -> (i32, i32) {
    %c0_i32 = arith.constant 0 : i32
    %c0_i32_0 = arith.constant 0 : i32
    %c0_i32_1 = arith.constant 0 : i32
    return %c0_i32, %c0_i32_0 : i32, i32
  }
  func.func @transform_6(%arg0: i32) -> (i32, i32) {
    %c0_i32 = arith.constant 0 : i32
    %c0_i32_0 = arith.constant 0 : i32
    %c0_i32_1 = arith.constant 0 : i32
    return %c0_i32, %c0_i32_0 : i32, i32
  }
  func.func @transform_7(%arg0: i32) -> (i32, i32) {
    %c0_i32 = arith.constant 0 : i32
    %c0_i32_0 = arith.constant 0 : i32
    return %arg0, %c0_i32 : i32, i32
  }
}

module attributes {stable_mosaic.version = 11 : i64} {
  func.func @_attn_block_kernel(%arg0: i32, %arg1: memref<1x8x32xf32, #tpu.memory_space<vmem>>, %arg2: memref<32x96xbf16, #tpu.memory_space<vmem>>, %arg3: memref<1x96xf32, #tpu.memory_space<vmem>>, %arg4: memref<32x32xbf16, #tpu.memory_space<vmem>>, %arg5: memref<1x32xf32, #tpu.memory_space<vmem>>, %arg6: memref<1x32xf32, #tpu.memory_space<vmem>>, %arg7: memref<1x32xf32, #tpu.memory_space<vmem>>, %arg8: memref<1x8x32xf32, #tpu.memory_space<vmem>>, %arg9: memref<1x4x8x8xf32, #tpu.memory_space<vmem>>) attributes {dimension_semantics = [#tpu.dimension_semantics<parallel>], iteration_bounds = array<i64: 2>, scalar_prefetch = 0 : i64, scratch_operands = 0 : i64, tpu.core_type = #tpu.core_type<tc>, window_params = [{transform_indices = @transform_0, window_bounds = array<i64: 1, 8, 32>}, {pipeline_mode = #tpu.pipeline_mode<synchronous>, transform_indices = @transform_1, window_bounds = array<i64: 32, 96>}, {pipeline_mode = #tpu.pipeline_mode<synchronous>, transform_indices = @transform_2, window_bounds = array<i64: 1, 96>}, {pipeline_mode = #tpu.pipeline_mode<synchronous>, transform_indices = @transform_3, window_bounds = array<i64: 32, 32>}, {pipeline_mode = #tpu.pipeline_mode<synchronous>, transform_indices = @transform_4, window_bounds = array<i64: 1, 32>}, {pipeline_mode = #tpu.pipeline_mode<synchronous>, transform_indices = @transform_5, window_bounds = array<i64: 1, 32>}, {pipeline_mode = #tpu.pipeline_mode<synchronous>, transform_indices = @transform_6, window_bounds = array<i64: 1, 32>}, {transform_indices = @transform_7, window_bounds = array<i64: 1, 8, 32>}, {transform_indices = @transform_8, window_bounds = array<i64: 1, 4, 8, 8>}]} {
    %c0 = arith.constant 0 : index
    %c0_0 = arith.constant 0 : index
    %c0_1 = arith.constant 0 : index
    %0 = vector.load %arg1[%c0, %c0_0, %c0_1] : memref<1x8x32xf32, #tpu.memory_space<vmem>>, vector<1x8x32xf32>
    %1 = vector.shape_cast %0 : vector<1x8x32xf32> to vector<8x32xf32>
    %2 = arith.truncf %1 : vector<8x32xf32> to vector<8x32xbf16>
    %c0_2 = arith.constant 0 : index
    %c0_3 = arith.constant 0 : index
    %3 = vector.load %arg2[%c0_2, %c0_3] : memref<32x96xbf16, #tpu.memory_space<vmem>>, vector<32x96xbf16>
    %cst = arith.constant dense<0.000000e+00> : vector<8x96xf32>
    %4 = tpu.matmul %2, %3, %cst {dimension_numbers = #tpu.dot_dimension_numbers<[1], [0], [0], [1], [0, 0, 1, 1], [], []>} : vector<8x32xbf16>, vector<32x96xbf16>, vector<8x96xf32> -> vector<8x96xf32>
    %c0_4 = arith.constant 0 : index
    %c0_5 = arith.constant 0 : index
    %5 = vector.load %arg3[%c0_4, %c0_5] : memref<1x96xf32, #tpu.memory_space<vmem>>, vector<1x96xf32>
    %6 = vector.broadcast %5 : vector<1x96xf32> to vector<8x96xf32>
    %7 = arith.addf %4, %6 : vector<8x96xf32>
    %8 = vector.extract_strided_slice %7 {offsets = [0, 0], sizes = [8, 8], strides = [1, 1]} : vector<8x96xf32> to vector<8x8xf32>
    %9 = vector.extract_strided_slice %7 {offsets = [0, 32], sizes = [8, 8], strides = [1, 1]} : vector<8x96xf32> to vector<8x8xf32>
    %10 = vector.extract_strided_slice %7 {offsets = [0, 64], sizes = [8, 8], strides = [1, 1]} : vector<8x96xf32> to vector<8x8xf32>
    %11 = arith.truncf %8 : vector<8x8xf32> to vector<8x8xbf16>
    %12 = arith.truncf %9 : vector<8x8xf32> to vector<8x8xbf16>
    %cst_6 = arith.constant dense<0.000000e+00> : vector<8x8xf32>
    %13 = tpu.matmul %11, %12, %cst_6 {dimension_numbers = #tpu.dot_dimension_numbers<[1], [1], [0], [0], [0, 0, 1, 0], [], []>} : vector<8x8xbf16>, vector<8x8xbf16>, vector<8x8xf32> -> vector<8x8xf32>
    %cst_7 = arith.constant 0.353553385 : f32
    %14 = vector.broadcast %cst_7 : f32 to vector<8x8xf32>
    %15 = arith.mulf %13, %14 : vector<8x8xf32>
    %cst_8 = arith.constant dense<0xFF800000> : vector<8xf32>
    %16 = vector.multi_reduction <maximumf>, %15, %cst_8 [1] : vector<8x8xf32> to vector<8xf32>
    %17 = vector.shape_cast %16 : vector<8xf32> to vector<8x1xf32>
    %18 = vector.broadcast %17 : vector<8x1xf32> to vector<8x8xf32>
    %19 = arith.subf %15, %18 : vector<8x8xf32>
    %20 = math.exp %19 : vector<8x8xf32>
    %cst_9 = arith.constant dense<0.000000e+00> : vector<8xf32>
    %21 = vector.multi_reduction <add>, %20, %cst_9 [1] : vector<8x8xf32> to vector<8xf32>
    %22 = vector.shape_cast %21 : vector<8xf32> to vector<8x1xf32>
    %23 = tpu.reciprocal %22 {approx = true} : vector<8x1xf32> -> vector<8x1xf32>
    %24 = vector.broadcast %23 : vector<8x1xf32> to vector<8x8xf32>
    %25 = arith.mulf %20, %24 : vector<8x8xf32>
    %c0_10 = arith.constant 0 : index
    %c0_11 = arith.constant 0 : index
    %c0_12 = arith.constant 0 : index
    %c0_13 = arith.constant 0 : index
    %26 = vector.load %arg9[%c0_10, %c0_11, %c0_12, %c0_13] : memref<1x4x8x8xf32, #tpu.memory_space<vmem>>, vector<1x1x8x8xf32>
    %27 = vector.shape_cast %26 : vector<1x1x8x8xf32> to vector<8x8xf32>
    %28 = vector.shape_cast %25 : vector<8x8xf32> to vector<1x1x8x8xf32>
    tpu.vector_store %arg9[%c0_10, %c0_11, %c0_12, %c0_13], %28 {strides = array<i32>} : memref<1x4x8x8xf32, #tpu.memory_space<vmem>>, vector<1x1x8x8xf32>,
    %29 = arith.truncf %25 : vector<8x8xf32> to vector<8x8xbf16>
    %30 = arith.truncf %10 : vector<8x8xf32> to vector<8x8xbf16>
    %cst_14 = arith.constant dense<0.000000e+00> : vector<8x8xf32>
    %31 = tpu.matmul %29, %30, %cst_14 {dimension_numbers = #tpu.dot_dimension_numbers<[1], [0], [0], [1], [0, 0, 1, 1], [], []>} : vector<8x8xbf16>, vector<8x8xbf16>, vector<8x8xf32> -> vector<8x8xf32>
    %32 = vector.extract_strided_slice %7 {offsets = [0, 8], sizes = [8, 8], strides = [1, 1]} : vector<8x96xf32> to vector<8x8xf32>
    %33 = vector.extract_strided_slice %7 {offsets = [0, 40], sizes = [8, 8], strides = [1, 1]} : vector<8x96xf32> to vector<8x8xf32>
    %34 = vector.extract_strided_slice %7 {offsets = [0, 72], sizes = [8, 8], strides = [1, 1]} : vector<8x96xf32> to vector<8x8xf32>
    %35 = arith.truncf %32 : vector<8x8xf32> to vector<8x8xbf16>
    %36 = arith.truncf %33 : vector<8x8xf32> to vector<8x8xbf16>
    %cst_15 = arith.constant dense<0.000000e+00> : vector<8x8xf32>
    %37 = tpu.matmul %35, %36, %cst_15 {dimension_numbers = #tpu.dot_dimension_numbers<[1], [1], [0], [0], [0, 0, 1, 0], [], []>} : vector<8x8xbf16>, vector<8x8xbf16>, vector<8x8xf32> -> vector<8x8xf32>
    %cst_16 = arith.constant 0.353553385 : f32
    %38 = vector.broadcast %cst_16 : f32 to vector<8x8xf32>
    %39 = arith.mulf %37, %38 : vector<8x8xf32>
    %cst_17 = arith.constant dense<0xFF800000> : vector<8xf32>
    %40 = vector.multi_reduction <maximumf>, %39, %cst_17 [1] : vector<8x8xf32> to vector<8xf32>
    %41 = vector.shape_cast %40 : vector<8xf32> to vector<8x1xf32>
    %42 = vector.broadcast %41 : vector<8x1xf32> to vector<8x8xf32>
    %43 = arith.subf %39, %42 : vector<8x8xf32>
    %44 = math.exp %43 : vector<8x8xf32>
    %cst_18 = arith.constant dense<0.000000e+00> : vector<8xf32>
    %45 = vector.multi_reduction <add>, %44, %cst_18 [1] : vector<8x8xf32> to vector<8xf32>
    %46 = vector.shape_cast %45 : vector<8xf32> to vector<8x1xf32>
    %47 = tpu.reciprocal %46 {approx = true} : vector<8x1xf32> -> vector<8x1xf32>
    %48 = vector.broadcast %47 : vector<8x1xf32> to vector<8x8xf32>
    %49 = arith.mulf %44, %48 : vector<8x8xf32>
    %c0_19 = arith.constant 0 : index
    %c1 = arith.constant 1 : index
    %c0_20 = arith.constant 0 : index
    %c0_21 = arith.constant 0 : index
    %50 = vector.load %arg9[%c0_19, %c1, %c0_20, %c0_21] : memref<1x4x8x8xf32, #tpu.memory_space<vmem>>, vector<1x1x8x8xf32>
    %51 = vector.shape_cast %50 : vector<1x1x8x8xf32> to vector<8x8xf32>
    %52 = vector.shape_cast %49 : vector<8x8xf32> to vector<1x1x8x8xf32>
    tpu.vector_store %arg9[%c0_19, %c1, %c0_20, %c0_21], %52 {strides = array<i32>} : memref<1x4x8x8xf32, #tpu.memory_space<vmem>>, vector<1x1x8x8xf32>,
    %53 = arith.truncf %49 : vector<8x8xf32> to vector<8x8xbf16>
    %54 = arith.truncf %34 : vector<8x8xf32> to vector<8x8xbf16>
    %cst_22 = arith.constant dense<0.000000e+00> : vector<8x8xf32>
    %55 = tpu.matmul %53, %54, %cst_22 {dimension_numbers = #tpu.dot_dimension_numbers<[1], [0], [0], [1], [0, 0, 1, 1], [], []>} : vector<8x8xbf16>, vector<8x8xbf16>, vector<8x8xf32> -> vector<8x8xf32>
    %56 = vector.extract_strided_slice %7 {offsets = [0, 16], sizes = [8, 8], strides = [1, 1]} : vector<8x96xf32> to vector<8x8xf32>
    %57 = vector.extract_strided_slice %7 {offsets = [0, 48], sizes = [8, 8], strides = [1, 1]} : vector<8x96xf32> to vector<8x8xf32>
    %58 = vector.extract_strided_slice %7 {offsets = [0, 80], sizes = [8, 8], strides = [1, 1]} : vector<8x96xf32> to vector<8x8xf32>
    %59 = arith.truncf %56 : vector<8x8xf32> to vector<8x8xbf16>
    %60 = arith.truncf %57 : vector<8x8xf32> to vector<8x8xbf16>
    %cst_23 = arith.constant dense<0.000000e+00> : vector<8x8xf32>
    %61 = tpu.matmul %59, %60, %cst_23 {dimension_numbers = #tpu.dot_dimension_numbers<[1], [1], [0], [0], [0, 0, 1, 0], [], []>} : vector<8x8xbf16>, vector<8x8xbf16>, vector<8x8xf32> -> vector<8x8xf32>
    %cst_24 = arith.constant 0.353553385 : f32
    %62 = vector.broadcast %cst_24 : f32 to vector<8x8xf32>
    %63 = arith.mulf %61, %62 : vector<8x8xf32>
    %cst_25 = arith.constant dense<0xFF800000> : vector<8xf32>
    %64 = vector.multi_reduction <maximumf>, %63, %cst_25 [1] : vector<8x8xf32> to vector<8xf32>
    %65 = vector.shape_cast %64 : vector<8xf32> to vector<8x1xf32>
    %66 = vector.broadcast %65 : vector<8x1xf32> to vector<8x8xf32>
    %67 = arith.subf %63, %66 : vector<8x8xf32>
    %68 = math.exp %67 : vector<8x8xf32>
    %cst_26 = arith.constant dense<0.000000e+00> : vector<8xf32>
    %69 = vector.multi_reduction <add>, %68, %cst_26 [1] : vector<8x8xf32> to vector<8xf32>
    %70 = vector.shape_cast %69 : vector<8xf32> to vector<8x1xf32>
    %71 = tpu.reciprocal %70 {approx = true} : vector<8x1xf32> -> vector<8x1xf32>
    %72 = vector.broadcast %71 : vector<8x1xf32> to vector<8x8xf32>
    %73 = arith.mulf %68, %72 : vector<8x8xf32>
    %c0_27 = arith.constant 0 : index
    %c2 = arith.constant 2 : index
    %c0_28 = arith.constant 0 : index
    %c0_29 = arith.constant 0 : index
    %74 = vector.load %arg9[%c0_27, %c2, %c0_28, %c0_29] : memref<1x4x8x8xf32, #tpu.memory_space<vmem>>, vector<1x1x8x8xf32>
    %75 = vector.shape_cast %74 : vector<1x1x8x8xf32> to vector<8x8xf32>
    %76 = vector.shape_cast %73 : vector<8x8xf32> to vector<1x1x8x8xf32>
    tpu.vector_store %arg9[%c0_27, %c2, %c0_28, %c0_29], %76 {strides = array<i32>} : memref<1x4x8x8xf32, #tpu.memory_space<vmem>>, vector<1x1x8x8xf32>,
    %77 = arith.truncf %73 : vector<8x8xf32> to vector<8x8xbf16>
    %78 = arith.truncf %58 : vector<8x8xf32> to vector<8x8xbf16>
    %cst_30 = arith.constant dense<0.000000e+00> : vector<8x8xf32>
    %79 = tpu.matmul %77, %78, %cst_30 {dimension_numbers = #tpu.dot_dimension_numbers<[1], [0], [0], [1], [0, 0, 1, 1], [], []>} : vector<8x8xbf16>, vector<8x8xbf16>, vector<8x8xf32> -> vector<8x8xf32>
    %80 = vector.extract_strided_slice %7 {offsets = [0, 24], sizes = [8, 8], strides = [1, 1]} : vector<8x96xf32> to vector<8x8xf32>
    %81 = vector.extract_strided_slice %7 {offsets = [0, 56], sizes = [8, 8], strides = [1, 1]} : vector<8x96xf32> to vector<8x8xf32>
    %82 = vector.extract_strided_slice %7 {offsets = [0, 88], sizes = [8, 8], strides = [1, 1]} : vector<8x96xf32> to vector<8x8xf32>
    %83 = arith.truncf %80 : vector<8x8xf32> to vector<8x8xbf16>
    %84 = arith.truncf %81 : vector<8x8xf32> to vector<8x8xbf16>
    %cst_31 = arith.constant dense<0.000000e+00> : vector<8x8xf32>
    %85 = tpu.matmul %83, %84, %cst_31 {dimension_numbers = #tpu.dot_dimension_numbers<[1], [1], [0], [0], [0, 0, 1, 0], [], []>} : vector<8x8xbf16>, vector<8x8xbf16>, vector<8x8xf32> -> vector<8x8xf32>
    %cst_32 = arith.constant 0.353553385 : f32
    %86 = vector.broadcast %cst_32 : f32 to vector<8x8xf32>
    %87 = arith.mulf %85, %86 : vector<8x8xf32>
    %cst_33 = arith.constant dense<0xFF800000> : vector<8xf32>
    %88 = vector.multi_reduction <maximumf>, %87, %cst_33 [1] : vector<8x8xf32> to vector<8xf32>
    %89 = vector.shape_cast %88 : vector<8xf32> to vector<8x1xf32>
    %90 = vector.broadcast %89 : vector<8x1xf32> to vector<8x8xf32>
    %91 = arith.subf %87, %90 : vector<8x8xf32>
    %92 = math.exp %91 : vector<8x8xf32>
    %cst_34 = arith.constant dense<0.000000e+00> : vector<8xf32>
    %93 = vector.multi_reduction <add>, %92, %cst_34 [1] : vector<8x8xf32> to vector<8xf32>
    %94 = vector.shape_cast %93 : vector<8xf32> to vector<8x1xf32>
    %95 = tpu.reciprocal %94 {approx = true} : vector<8x1xf32> -> vector<8x1xf32>
    %96 = vector.broadcast %95 : vector<8x1xf32> to vector<8x8xf32>
    %97 = arith.mulf %92, %96 : vector<8x8xf32>
    %c0_35 = arith.constant 0 : index
    %c3 = arith.constant 3 : index
    %c0_36 = arith.constant 0 : index
    %c0_37 = arith.constant 0 : index
    %98 = vector.load %arg9[%c0_35, %c3, %c0_36, %c0_37] : memref<1x4x8x8xf32, #tpu.memory_space<vmem>>, vector<1x1x8x8xf32>
    %99 = vector.shape_cast %98 : vector<1x1x8x8xf32> to vector<8x8xf32>
    %100 = vector.shape_cast %97 : vector<8x8xf32> to vector<1x1x8x8xf32>
    tpu.vector_store %arg9[%c0_35, %c3, %c0_36, %c0_37], %100 {strides = array<i32>} : memref<1x4x8x8xf32, #tpu.memory_space<vmem>>, vector<1x1x8x8xf32>,
    %101 = arith.truncf %97 : vector<8x8xf32> to vector<8x8xbf16>
    %102 = arith.truncf %82 : vector<8x8xf32> to vector<8x8xbf16>
    %cst_38 = arith.constant dense<0.000000e+00> : vector<8x8xf32>
    %103 = tpu.matmul %101, %102, %cst_38 {dimension_numbers = #tpu.dot_dimension_numbers<[1], [0], [0], [1], [0, 0, 1, 1], [], []>} : vector<8x8xbf16>, vector<8x8xbf16>, vector<8x8xf32> -> vector<8x8xf32>
    %104 = tpu.concatenate %31, %55, %79, %103 in 1 : vector<8x8xf32>, vector<8x8xf32>, vector<8x8xf32>, vector<8x8xf32> -> vector<8x32xf32>
    %105 = arith.truncf %104 : vector<8x32xf32> to vector<8x32xbf16>
    %c0_39 = arith.constant 0 : index
    %c0_40 = arith.constant 0 : index
    %106 = vector.load %arg4[%c0_39, %c0_40] : memref<32x32xbf16, #tpu.memory_space<vmem>>, vector<32x32xbf16>
    %cst_41 = arith.constant dense<0.000000e+00> : vector<8x32xf32>
    %107 = tpu.matmul %105, %106, %cst_41 {dimension_numbers = #tpu.dot_dimension_numbers<[1], [0], [0], [1], [0, 0, 1, 1], [], []>} : vector<8x32xbf16>, vector<32x32xbf16>, vector<8x32xf32> -> vector<8x32xf32>
    %c0_42 = arith.constant 0 : index
    %c0_43 = arith.constant 0 : index
    %108 = vector.load %arg5[%c0_42, %c0_43] : memref<1x32xf32, #tpu.memory_space<vmem>>, vector<1x32xf32>
    %109 = vector.broadcast %108 : vector<1x32xf32> to vector<8x32xf32>
    %110 = arith.addf %107, %109 : vector<8x32xf32>
    %111 = arith.addf %1, %110 : vector<8x32xf32>
    %cst_44 = arith.constant dense<0.000000e+00> : vector<8xf32>
    %112 = vector.multi_reduction <add>, %111, %cst_44 [1] : vector<8x32xf32> to vector<8xf32>
    %113 = vector.shape_cast %112 : vector<8xf32> to vector<8x1xf32>
    %cst_45 = arith.constant 3.200000e+01 : f32
    %114 = vector.broadcast %cst_45 : f32 to vector<8x1xf32>
    %115 = arith.divf %113, %114 : vector<8x1xf32>
    %116 = vector.broadcast %115 : vector<8x1xf32> to vector<8x32xf32>
    %117 = arith.subf %111, %116 : vector<8x32xf32>
    %118 = arith.mulf %117, %117 : vector<8x32xf32>
    %cst_46 = arith.constant dense<0.000000e+00> : vector<8xf32>
    %119 = vector.multi_reduction <add>, %118, %cst_46 [1] : vector<8x32xf32> to vector<8xf32>
    %120 = vector.shape_cast %119 : vector<8xf32> to vector<8x1xf32>
    %cst_47 = arith.constant 3.200000e+01 : f32
    %121 = vector.broadcast %cst_47 : f32 to vector<8x1xf32>
    %122 = arith.divf %120, %121 : vector<8x1xf32>
    %123 = vector.broadcast %115 : vector<8x1xf32> to vector<8x32xf32>
    %124 = arith.subf %111, %123 : vector<8x32xf32>
    %cst_48 = arith.constant 9.99999974E-6 : f32
    %125 = vector.broadcast %cst_48 : f32 to vector<8x1xf32>
    %126 = arith.addf %122, %125 : vector<8x1xf32>
    %127 = math.rsqrt %126 : vector<8x1xf32>
    %128 = vector.broadcast %127 : vector<8x1xf32> to vector<8x32xf32>
    %129 = arith.mulf %124, %128 : vector<8x32xf32>
    %c0_49 = arith.constant 0 : index
    %c0_50 = arith.constant 0 : index
    %130 = vector.load %arg6[%c0_49, %c0_50] : memref<1x32xf32, #tpu.memory_space<vmem>>, vector<1x32xf32>
    %131 = vector.broadcast %130 : vector<1x32xf32> to vector<8x32xf32>
    %132 = arith.mulf %129, %131 : vector<8x32xf32>
    %c0_51 = arith.constant 0 : index
    %c0_52 = arith.constant 0 : index
    %133 = vector.load %arg7[%c0_51, %c0_52] : memref<1x32xf32, #tpu.memory_space<vmem>>, vector<1x32xf32>
    %134 = vector.broadcast %133 : vector<1x32xf32> to vector<8x32xf32>
    %135 = arith.addf %132, %134 : vector<8x32xf32>
    %c0_53 = arith.constant 0 : index
    %c0_54 = arith.constant 0 : index
    %c0_55 = arith.constant 0 : index
    %136 = vector.load %arg8[%c0_53, %c0_54, %c0_55] : memref<1x8x32xf32, #tpu.memory_space<vmem>>, vector<1x8x32xf32>
    %137 = vector.shape_cast %136 : vector<1x8x32xf32> to vector<8x32xf32>
    %138 = vector.shape_cast %135 : vector<8x32xf32> to vector<1x8x32xf32>
    tpu.vector_store %arg8[%c0_53, %c0_54, %c0_55], %138 {strides = array<i32>} : memref<1x8x32xf32, #tpu.memory_space<vmem>>, vector<1x8x32xf32>,
    return
  }
  func.func @transform_0(%arg0: i32) -> (i32, i32, i32) {
    %c0_i32 = arith.constant 0 : i32
    %c0_i32_0 = arith.constant 0 : i32
    %c0_i32_1 = arith.constant 0 : i32
    return %arg0, %c0_i32, %c0_i32_0 : i32, i32, i32
  }
  func.func @transform_1(%arg0: i32) -> (i32, i32) {
    %c0_i32 = arith.constant 0 : i32
    %c0_i32_0 = arith.constant 0 : i32
    %c0_i32_1 = arith.constant 0 : i32
    return %c0_i32, %c0_i32_0 : i32, i32
  }
  func.func @transform_2(%arg0: i32) -> (i32, i32) {
    %c0_i32 = arith.constant 0 : i32
    %c0_i32_0 = arith.constant 0 : i32
    %c0_i32_1 = arith.constant 0 : i32
    return %c0_i32, %c0_i32_0 : i32, i32
  }
  func.func @transform_3(%arg0: i32) -> (i32, i32) {
    %c0_i32 = arith.constant 0 : i32
    %c0_i32_0 = arith.constant 0 : i32
    %c0_i32_1 = arith.constant 0 : i32
    return %c0_i32, %c0_i32_0 : i32, i32
  }
  func.func @transform_4(%arg0: i32) -> (i32, i32) {
    %c0_i32 = arith.constant 0 : i32
    %c0_i32_0 = arith.constant 0 : i32
    %c0_i32_1 = arith.constant 0 : i32
    return %c0_i32, %c0_i32_0 : i32, i32
  }
  func.func @transform_5(%arg0: i32) -> (i32, i32) {
    %c0_i32 = arith.constant 0 : i32
    %c0_i32_0 = arith.constant 0 : i32
    %c0_i32_1 = arith.constant 0 : i32
    return %c0_i32, %c0_i32_0 : i32, i32
  }
  func.func @transform_6(%arg0: i32) -> (i32, i32) {
    %c0_i32 = arith.constant 0 : i32
    %c0_i32_0 = arith.constant 0 : i32
    %c0_i32_1 = arith.constant 0 : i32
    return %c0_i32, %c0_i32_0 : i32, i32
  }
  func.func @transform_7(%arg0: i32) -> (i32, i32, i32) {
    %c0_i32 = arith.constant 0 : i32
    %c0_i32_0 = arith.constant 0 : i32
    %c0_i32_1 = arith.constant 0 : i32
    return %arg0, %c0_i32, %c0_i32_0 : i32, i32, i32
  }
  func.func @transform_8(%arg0: i32) -> (i32, i32, i32, i32) {
    %c0_i32 = arith.constant 0 : i32
    %c0_i32_0 = arith.constant 0 : i32
    %c0_i32_1 = arith.constant 0 : i32
    %c0_i32_2 = arith.constant 0 : i32
    return %arg0, %c0_i32, %c0_i32_0, %c0_i32_1 : i32, i32, i32, i32
  }
}

</mosaic_0001>

<bundles_post_ra>
// kernel: _lambda_.3
= control target key start
LH: loop header
LB: loop body
LE: loop exit
PB: predicated region body
PF: predicated region fallthrough
CT: control target
= control target key end

     0   :  { %v328_v1 = vmov 0.0   ;;  %vm329_vm0 = vmmov 0   ;;  %vm54_vm1 = vcmask 261120   ;;  %s419_s0 = inlined_call_operand.vmem [shape: f32[16,32], index: 0, kind: input, shape index: {}]   ;;  %s420_s1 = inlined_call_operand.vmem [shape: bf16[32,64], index: 1, kind: input, shape index: {}]   ;;  %s421_s2 = inlined_call_operand.vmem [shape: f32[1,64], index: 2, kind: input, shape index: {}]   ;;  %s422_s3 = inlined_call_operand.vmem [shape: bf16[64,32], index: 3, kind: input, shape index: {}]   ;;  %s423_s4 = inlined_call_operand.vmem [shape: f32[1,32], index: 4, kind: input, shape index: {}]   ;;  %s424_s5 = inlined_call_operand.vmem [shape: f32[1,32], index: 5, kind: input, shape index: {}]   ;;  %s425_s6 = inlined_call_operand.vmem [shape: f32[1,32], index: 6, kind: input, shape index: {}]   ;;  %s426_s7 = inlined_call_operand.hbm [shape: f32[16,32], index: 7, kind: output, shape index: {}]  }
   0x1   :  { %v296_v0 = vld [vmem:[%s420_s1 + $0x8] sm:$0xff]   ;;  %271 = vmatprep.subr.bf16.mxu0 %v328_v1  ;;  %v297_v2 = vld [vmem:[%s420_s1] sm:$0xff]   ;;  %279 = vmatprep.subr.bf16.mxu1 %v328_v1  ;;  %v298_v5 = vld [vmem:[%s422_s3 + $0x18] sm:$0xff]  }
   0x2   :  { %272 = vmatpush3.bf16.msra.mxu0 %v296_v0  ;;  %275 = vmatprep.mubr.msk.bf16.mxu0 %vm329_vm0, %v328_v1  ;;  %v28_v3 = vld [vmem:[%s419_s0] sm:$0xff]  ;;  %v29_v4 = vld [vmem:[%s419_s0 + $0x8] sm:$0xff] }
   0x3   :  { %273 = vmatprep.subr.bf16.mxu0 %v328_v1  ;;  %287 = vmatprep.mubr.msk.bf16.mxu1 %vm329_vm0, %v328_v1  ;;  %v30_v6 = vpack.c.bf16 %v29_v4, %v28_v3 }
   0x4   :  { %280 = vmatpush3.bf16.msra.mxu1 %v298_v5 }
   0x5   :  { %281 = vmatprep.subr.bf16.mxu1 %v328_v1 }
   0x6   :  { %274 = vmatpush3.bf16.msra.mxu0 %v297_v2 }
   0x7   :  { %12 = vsyncpa [#allocation3], 0  ;;  %v299_v7 = vld [vmem:[%s422_s3 + $0x10] sm:$0xff]   ;;  %v300_v8 = vld [vmem:[%s422_s3 + $0x8] sm:$0xff]   ;;  %vm141_vm2 = vcmask 523264   ;;  %s330_s20 = smov [#allocation2]  }
   0x8   :  { %282 = vmatpush3.bf16.msra.mxu1 %v299_v7  ;;  %v301_v9 = vld [vmem:[%s422_s3] sm:$0xff]   ;;  %s240_s21 = sshll.u32 %s330_s20, 4  ;;  %s241_s21 = int_to_ptr.vmem [resolvable:$true] %s240_s21 }
   0x9   :  { %276 = vmatmul.mubr.msk.bf16.vlgmr.msra.gmra.mxu0 %vm54_vm1, %v30_v6  ;;  %283 = vmatprep.subr.bf16.mxu1 %v328_v1  ;;  %v251_v10 = vld [vmem:[%s421_s2] ss:$0 sm:$0xff]  ;;  %s306_s22 = scalar_lea.vmem %s241_s21, 256  ;;  %p311_p1 = scmp.lt.s32.totalorder %s241_s21, %s241_s21 }
   0xa   :  { %v255_v20 = vld [vmem:[%s423_s4] ss:$0 sm:$0xff]  ;;  %p307_p0 = scmp.ne.s32.totalorder %s241_s21, %s306_s22  ;;  %p312_p2 = scmp.lt.s32.totalorder %s306_s22, %s306_s22 }
   0xb   :  { %v261_v48 = vld [vmem:[%s424_s5] ss:$0 sm:$0xff] }
   0xc   :  { %284 = vmatpush3.bf16.msra.mxu1 %v300_v8  ;;  %v262_v50 = vld [vmem:[%s425_s6] ss:$0 sm:$0xff]  ;;  %p313_p3 = por %p312_p2, %p311_p1 }
   0xd   :  { %285 = vmatprep.subr.bf16.mxu1 %v328_v1 }
   0xe   :  { %p314_p4 = pnand %p313_p3, %p307_p0 }
  0x10   :  { %286 = vmatpush3.bf16.msra.mxu1 %v301_v9 }
  0xc9   :  { %v92_v11 = vpop.f32.mrf.mxu0 }
  0xca   :  { %v93_v13 = vadd.f32 %v251_v10, %v92_v11 }
  0xcb   :  { %v277_v12 = vpop.f32.mrf.mxu0 }
  0xcc   :  { %v99_v17 = vmax.f32 %v93_v13, 0.0 }
  0xcd   :  { %v95_v14 = vpop.f32.mrf.mxu0 }
  0xce   :  { %v96_v15 = vadd.f32 %v251_v10, %v95_v14 }
  0xcf   :  { %v278_v16 = vpop.f32.mrf.mxu0 }
  0xd0   :  { %v100_v18 = vmax.f32 %v96_v15, 0.0 }
  0xd2   :  { %v101_v19 = vpack.c.bf16 %v100_v18, %v99_v17 }
  0xd4   :  { %288 = vmatmul.mubr.msk.bf16.vlgmr.msra.gmra.mxu1 %vm141_vm2, %v101_v19 }
 0x194   :  { %v179_v21 = vpop.f32.mrf.mxu1 }
 0x195   :  { %v180_v22 = vadd.f32 %v255_v20, %v179_v21 }
 0x196   :  { %v289_v23 = vpop.f32.mrf.mxu1 }
 0x197   :  { %v186_v24 = vadd.f32 %v180_v22, %v28_v3 }
 0x198   :  { %v182_v25 = vpop.f32.mrf.mxu1 }
 0x199   :  { %v183_v26 = vadd.f32 %v255_v20, %v182_v25  ;;  %v188_v27 = vsel %vm54_vm1, %v186_v24, 0.0 }
 0x19a   :  { %189 = vadd.xlane.f32.xlu0 %v188_v27  ;;  %v290_v28 = vpop.f32.mrf.mxu1 }
 0x19b   :  { %v187_v29 = vadd.f32 %v183_v26, %v29_v4 }
 0x19d   :  { %v191_v30 = vsel %vm54_vm1, %v187_v29, 0.0 }
 0x19e   :  { %192 = vadd.xlane.f32.xlu0 %v191_v30 }
 0x223   :  { %v190_v31 = vpop.xlane.xlu0 %189 }
 0x224   :  { %v195_v32 = vmul.f32 0.03125, %v190_v31 }
 0x226   :  { %v197_v33 = vsub.f32 %v186_v24, %v195_v32 }
 0x227   :  { %v193_v34 = vpop.xlane.xlu0 %192 }
 0x228   :  { %v196_v35 = vmul.f32 0.03125, %v193_v34  ;;  %v199_v36 = vmul.f32 %v197_v33, %v197_v33 }
 0x22a   :  { %v198_v37 = vsub.f32 %v187_v29, %v196_v35  ;;  %v201_v38 = vsel %vm54_vm1, %v199_v36, 0.0 }
 0x22b   :  { %202 = vadd.xlane.f32.xlu1 %v201_v38 }
 0x22c   :  { %v200_v39 = vmul.f32 %v198_v37, %v198_v37 }
 0x22e   :  { %v204_v40 = vsel %vm54_vm1, %v200_v39, 0.0 }
 0x22f   :  { %205 = vadd.xlane.f32.xlu1 %v204_v40 }
 0x2b4   :  { %v203_v41 = vpop.xlane.xlu1 %202 }
 0x2b5   :  { %v207_v42 = vmul.f32 0.03125, %v203_v41 }
 0x2b7   :  { %v209_v43 = vadd.f32 1e-05, %v207_v42 }
 0x2b8   :  { %v206_v44 = vpop.xlane.xlu1 %205 }
 0x2b9   :  { %302 = vrsqrt.f32 %v209_v43  ;;  %v208_v45 = vmul.f32 0.03125, %v206_v44 }
 0x2bb   :  { %v210_v46 = vadd.f32 1e-05, %v208_v45 }
 0x2bd   :  { %304 = vrsqrt.f32 %v210_v46 }
 0x2c6   :  { %v303_v47 = vpop.eup %302 }
 0x2c7   :  { %v213_v49 = vmul.f32 %v303_v47, %v197_v33 }
 0x2c9   :  { %v222_v51 = vmul.f32 %v261_v48, %v213_v49 }
 0x2ca   :  { %v305_v52 = vpop.eup %304 }
 0x2cb   :  { %v214_v53 = vmul.f32 %v305_v52, %v198_v37  ;;  %v231_v54 = vadd.f32 %v262_v50, %v222_v51 }
 0x2cd   :  { %v223_v55 = vmul.f32 %v261_v48, %v214_v53  ;;  %233 = vst.msk [vmem:[#allocation2] sm:$0xff] %vm54_vm1, %v231_v54 }
 0x2cf   :  { %v232_v56 = vadd.f32 %v262_v50, %v223_v55 }
 0x2d1   :  { %234 = vst.msk [vmem:[#allocation2 + $0x8] sm:$0xff] %vm54_vm1, %v232_v56 }
 0x2d2   :  { %317 = shalt.err (!%p314_p4)
}
 0x2d3   :  { %s331_s5 = smov 128   ;;  %s332_s6 = smov 8  }
 0x2d4   :  { %246 = dma.vmem_to_hbm [thread:$0]  %s241_s21, 256, %s426_s7, [#allocation3], %s331_s5, %s331_s5, %s332_s6  }
 0x2d5   :  { %326 = dma.done.wait [#allocation3], 256  }
 0x2d6   :  { %327 = vsyncadd [#allocation3], 4294967040 }
 0x2d7   :  { %250 = vsyncpa [#allocation3], 1 }

// kernel: _lambda_.2
= control target key start
LH: loop header
LB: loop body
LE: loop exit
PB: predicated region body
PF: predicated region fallthrough
CT: control target
= control target key end

     0   :  { %14 = vsyncpa [#allocation3], 0  ;;  %s1615_s0 = inlined_call_operand.vmem [shape: f32[2,8,32], index: 0, kind: input, shape index: {}]   ;;  %s1616_s1 = inlined_call_operand.vmem [shape: bf16[32,96], index: 1, kind: input, shape index: {}]   ;;  %s1617_s2 = inlined_call_operand.vmem [shape: f32[1,96], index: 2, kind: input, shape index: {}]   ;;  %s1618_s3 = inlined_call_operand.vmem [shape: bf16[32,32], index: 3, kind: input, shape index: {}]   ;;  %s1619_s4 = inlined_call_operand.vmem [shape: f32[1,32], index: 4, kind: input, shape index: {}]   ;;  %s1620_s5 = inlined_call_operand.vmem [shape: f32[1,32], index: 5, kind: input, shape index: {}]   ;;  %s1621_s6 = inlined_call_operand.vmem [shape: f32[1,32], index: 6, kind: input, shape index: {}]   ;;  %s1622_s7 = inlined_call_operand.vmem [shape: f32[2,8,32], index: 7, kind: output, shape index: {0}]   ;;  %s1623_s8 = inlined_call_operand.hbm [shape: f32[2,4,8,8], index: 8, kind: output, shape index: {1}]  }
   0x1   :  { %16 = vsyncpa [#allocation3 + $0x1], 0  ;;  %s1381_s27 = smov 0   ;;  %s1383_s28 = smov 0  }
   0x2   :  { %s1385_s29 = smov 0   ;;  %s1387_s30 = smov 0  }
   0x3 LB: > { %s1402_s9 = sadd.s32 4294967295, %s1316_s30   ;;  %s1058_s10 = sadd.s32 4294967294, %s1316_s30   ;;  %s1316_s30 = sphi %s1387_s30, %s1631_s30   ;;  %s1312_s29 = sphi %s1385_s29, %s1630_s29   ;;  %s1308_s28 = sphi %s1383_s28, %s1629_s28   ;;  %s1304_s27 = sphi %s1381_s27, %s1628_s27  }
   0x4   : > { %s1406_s11 = sadd.s32 1, %s1316_s30   ;;  %s207_s12 = sadd.s32 1, %s1312_s29 }
   0x5   : > { %s204_s13 = ssub.s32 %s1316_s30, %s1406_s11  ;;  %p217_p0 = scmp.ne.s32.totalorder %s1312_s29, %s1308_s28 }
   0x6   : > { %p205_p1 = scmp.eq.s32.totalorder %s204_s13, 0  ;;  %p218_p2 = scmp.eq.s32.totalorder %s1402_s9, 1 }
   0x7   : > { %p223_p3 = scmp.ne.s32.totalorder %s1308_s28, %s1304_s27  ;;  %p224_p4 = scmp.eq.s32.totalorder %s1058_s10, 1 }
   0x8   : > { %s1417_s14 = scalar_select %p205_p1, %s1312_s29, %s207_s12  }
   0x9   : > { %p1419_p5 = por %p218_p2, %p217_p0  ;;  %p1423_p6 = por %p224_p4, %p223_p3 }
   0xa   : > { %p1061_p7 = scmp.ge.s32.totalorder %s1316_s30, 1  ;;  %p267_p8 = scmp.lt.s32.totalorder %s1316_s30, 3 }
   0xc   : > { %p268_p9 = pnand %p1061_p7, %p267_p8 }
   0xd   : > { %p304_p10 = scmp.lt.s32.totalorder (!%p268_p9), %s1402_s9, 1  ;;  %s1320_s12 = smov (!%p268_p9), 120  }
   0xe   : > { %271 = sbr.rel (%p268_p9) target bundleno = 1735 (0x6c7), region = 48  ;;  %s1321_s13 = smov (!%p268_p9), 96  }
   0xf   : > { %s1322_s17 = smov (!%p268_p9), 80   ;;  %s1323_s18 = smov (!%p268_p9), 88  }
  0x10   : > { %s1324_s19 = smov (!%p268_p9), 72   ;;  %s1325_s20 = smov (!%p268_p9), 112  }
  0x11   : > { %s1326_s23 = smov (!%p268_p9), 104   ;;  %s1327_s24 = smov (!%p268_p9), 56  }
  0x12   : > { %s1329_s26 = smov (!%p268_p9), 40   ;;  %s1330_s10 = smov (!%p268_p9), 48  }
  0x13   : > { %v1234_v0 = vld [vmem:[%s1616_s1 + $0x8] sm:$0xff]   ;;  %v1318_v1 = vmov 0.0   ;;  %v1235_v2 = vld [vmem:[%s1616_s1] sm:$0xff]   ;;  %vm1319_vm0 = vmmov 0   ;;  %s1444_s21 = scalar_select %p304_p10, %s1402_s9, 1  ;;  %vm338_vm1 = vcmask 261120  }
  0x14   : > { %1114 = vmatprep.subr.bf16.mxu0 %v1318_v1  ;;  %1122 = vmatprep.subr.bf16.mxu1 %v1318_v1  ;;  %v1065_v5 = vld [vmem:[%s1617_s2] ss:$0 sm:$0xff]  ;;  %vm386_vm2 = vcmask 64512   ;;  %vm452_vm3 = vcmask 1043456   ;;  %vm848_vm4 = vcmask 130048   ;;  %vm850_vm5 = vcmask 195584  }
  0x15   : > { %1115 = vmatpush3.bf16.msra.mxu0 %v1234_v0  ;;  %1118 = vmatprep.mubr.msk.bf16.mxu0 %vm1319_vm0, %v1318_v1  ;;  %s1624_s22 = sshll.u32 %s1444_s21, 3 }
  0x16   : > { %1116 = vmatprep.subr.bf16.mxu0 %v1318_v1  ;;  %1124 = vmatprep.mubr.msk.bf16.mxu1 %vm1319_vm0, %v1318_v1  ;;  %s307_s25 = scalar_lea.vmem %s1615_s0, %s1624_s22 }
  0x17   : > { %v1453_v3 = vld [vmem:[%s307_s25] sm:$0xff]  ;;  %s1328_s25 = smov 64  }
  0x18   : > { %v314_v4 = vpack.c.bf16 %v1453_v3, %v1453_v3 }
  0x19   : > { %1117 = vmatpush3.bf16.msra.mxu0 %v1235_v2 }
  0x1a   : > { %1128 = vmatprep.subr.bf16.mxu0 %v1318_v1 }
  0x1c   : > { %1119 = vmatmul.mubr.msk.bf16.vlgmr.msra.gmra.mxu0 %vm338_vm1, %v314_v4 }
  0x1d   : > { %1130 = vmatprep.mubr.msk.bf16.mxu0 %vm1319_vm0, %v1318_v1 }
  0xdc   : > { %v376_v6 = vpop.f32.mrf.mxu0 }
  0xdd   : > { %v377_v7 = vadd.f32 %v1065_v5, %v376_v6 }
  0xde   : > { %v1120_v8 = vpop.f32.mrf.mxu0 }
  0xdf   : > { %v1463_v9 = vpack.c.bf16 %v377_v7, %v377_v7 }
  0xe0   : > { %v379_v10 = vpop.f32.mrf.mxu0 }
  0xe1   : > { %496 = vrot.lane.b32.xlu1 %v1463_v9, %s1320_s12  ;;  %384 = vrot.lane.b32.xlu0 %v1463_v9, %s1321_s13  ;;  %s301_s12 = sand.u32 1, %s1308_s28  }
  0xe2   : > { %v1121_v11 = vpop.f32.mrf.mxu0  ;;  %s1062_s13 = sshll.u32 %s301_s12, 5 }
  0xe5   : > { %611 = vrot.lane.b32.xlu1 %v1463_v9, %s1322_s17  ;;  %498 = vrot.lane.b32.xlu0 %v1463_v9, %s1323_s18  ;;  %s1508_s17 = scalar_lea.vmem [#allocation2], %s1062_s13  ;;  %s1331_s18 = smov 8  }
  0xe9   : > { %724 = vrot.lane.b32.xlu1 %v1463_v9, %s1324_s19  ;;  %609 = vrot.lane.b32.xlu0 %v1463_v9, %s1325_s20  ;;  %s1091_s19 = sshll.u32 %s1402_s9, 9  ;;  %s972_s20 = sshll.u32 %s1508_s17, 4  ;;  %s1558_s20 = int_to_ptr.vmem [resolvable:$true] %s972_s20 }
  0xea   : > { %s1334_s9 = smov [#allocation2]  }
  0xed   : > { %722 = vrot.lane.b32.xlu0 %v1463_v9, %s1326_s23 }
 0x153   : > { %v385_v12 = vpop.permute.xlu0 %384  ;;  %v497_v15 = vpop.permute.xlu1 %496 }
 0x154   : > { %v391_v13 = vsel %vm386_vm2, %v385_v12, 0 }
 0x155   : > { %1123 = vmatpush3.bf16.xpose.msra.mxu1 %v391_v13 }
 0x156   : > { %1134 = vmatprep.subr.bf16.mxu1 %v1318_v1 }
 0x157   : > { %v499_v14 = vpop.permute.xlu0 %498  ;;  %v612_v17 = vpop.permute.xlu1 %611 }
 0x158   : > { %v504_v16 = vsel %vm386_vm2, %v499_v14, 0  ;;  %v617_v18 = vsel %vm386_vm2, %v612_v17, 0 }
 0x15b   : > { %v725_v19 = vpop.permute.xlu1 %724  ;;  %v610_v20 = vpop.permute.xlu0 %609 }
 0x15c   : > { %1125 = vmatmul.mubr.msk.bf16.vlgmr.msra.gmra.mxu1 %vm386_vm2, %v1463_v9  ;;  %v730_v21 = vsel %vm386_vm2, %v725_v19, 0 }
 0x15d   : > { %1135 = vmatpush3.bf16.xpose.msra.mxu1 %v504_v16  ;;  %1136 = vmatprep.mubr.msk.bf16.mxu1 %vm1319_vm0, %v1318_v1 }
 0x15e   : > { %1146 = vmatprep.subr.bf16.mxu1 %v1318_v1 }
 0x15f   : > { %v723_v22 = vpop.permute.xlu0 %722 }
 0x164   : > { %1137 = vmatmul.mubr.msk.bf16.vlgmr.msra.gmra.mxu1 %vm386_vm2, %v497_v15 }
 0x165   : > { %1147 = vmatpush3.bf16.xpose.msra.mxu1 %v617_v18  ;;  %1148 = vmatprep.mubr.msk.bf16.mxu1 %vm1319_vm0, %v1318_v1 }
 0x166   : > { %1158 = vmatprep.subr.bf16.mxu1 %v1318_v1 }
 0x16c   : > { %1149 = vmatmul.mubr.msk.bf16.vlgmr.msra.gmra.mxu1 %vm386_vm2, %v610_v20 }
 0x16d   : > { %1159 = vmatpush3.bf16.xpose.msra.mxu1 %v730_v21  ;;  %1160 = vmatprep.mubr.msk.bf16.mxu1 %vm1319_vm0, %v1318_v1 }
 0x16e   : > { %1170 = vmatprep.subr.bf16.mxu1 %v1318_v1 }
 0x174   : > { %1161 = vmatmul.mubr.msk.bf16.vlgmr.msra.gmra.mxu1 %vm386_vm2, %v723_v22 }
 0x175   : > { %1174 = vmatprep.mubr.msk.bf16.mxu1 %vm1319_vm0, %v1318_v1 }
 0x21c   : > { %v427_v23 = vpop.f32.mrf.mxu1 }
 0x21d   : > { %v433_v24 = vmul.f32 0.35355338, %v427_v23 }
 0x21e   : > { %v1126_v25 = vpop.f32.mrf.mxu1 }
 0x21f   : > { %v434_v26 = vsel %vm386_vm2, %v433_v24, -inf }
 0x220   : > { %435 = vmax.xlane.f32.xlu1 %v434_v26  ;;  %v430_v27 = vpop.f32.mrf.mxu1 }
 0x222   : > { %v1127_v28 = vpop.f32.mrf.mxu1 }
 0x224   : > { %v540_v29 = vpop.f32.mrf.mxu1 }
 0x225   : > { %v546_v30 = vmul.f32 0.35355338, %v540_v29 }
 0x226   : > { %v1138_v31 = vpop.f32.mrf.mxu1 }
 0x227   : > { %v547_v32 = vsel %vm386_vm2, %v546_v30, -inf }
 0x228   : > { %548 = vmax.xlane.f32.xlu0 %v547_v32  ;;  %v543_v33 = vpop.f32.mrf.mxu1 }
 0x22a   : > { %v1139_v34 = vpop.f32.mrf.mxu1 }
 0x22c   : > { %v653_v35 = vpop.f32.mrf.mxu1 }
 0x22d   : > { %v659_v36 = vmul.f32 0.35355338, %v653_v35 }
 0x22e   : > { %v1150_v37 = vpop.f32.mrf.mxu1 }
 0x22f   : > { %v660_v38 = vsel %vm386_vm2, %v659_v36, -inf  ;;  %v1236_v37 = vld [vmem:[%s1618_s3 + $0x8] sm:$0xff]  }
 0x230   : > { %661 = vmax.xlane.f32.xlu0 %v660_v38  ;;  %v656_v39 = vpop.f32.mrf.mxu1  ;;  %1171 = vmatpush3.bf16.msra.mxu1 %v1236_v37  ;;  %v1237_v38 = vld [vmem:[%s1618_s3] sm:$0xff]  }
 0x231   : > { %1172 = vmatprep.subr.bf16.mxu1 %v1318_v1 }
 0x232   : > { %v1151_v40 = vpop.f32.mrf.mxu1 }
 0x234   : > { %v766_v41 = vpop.f32.mrf.mxu1  ;;  %1173 = vmatpush3.bf16.msra.mxu1 %v1237_v38 }
 0x235   : > { %v772_v42 = vmul.f32 0.35355338, %v766_v41 }
 0x236   : > { %v1162_v43 = vpop.f32.mrf.mxu1 }
 0x237   : > { %v773_v44 = vsel %vm386_vm2, %v772_v42, -inf }
 0x238   : > { %774 = vmax.xlane.f32.xlu1 %v773_v44  ;;  %v769_v45 = vpop.f32.mrf.mxu1 }
 0x23a   : > { %v1163_v46 = vpop.f32.mrf.mxu1 }
 0x2a9   : > { %v436_v47 = vpop.xlane.xlu1 %435 }
 0x2aa   : > { %v437_v48 = vsub.f32 %v433_v24, %v436_v47 }
 0x2ac   : > { %v438_v49 = vmul.f32 1.442695, %v437_v48 }
 0x2ae   : > { %1238 = vpow2.f32 %v438_v49 }
 0x2b1   : > { %v549_v50 = vpop.xlane.xlu0 %548 }
 0x2b2   : > { %v550_v51 = vsub.f32 %v546_v30, %v549_v50 }
 0x2b4   : > { %v551_v52 = vmul.f32 1.442695, %v550_v51 }
 0x2b6   : > { %1240 = vpow2.f32 %v551_v52 }
 0x2b9   : > { %v662_v53 = vpop.xlane.xlu0 %661 }
 0x2ba   : > { %v663_v54 = vsub.f32 %v659_v36, %v662_v53  ;;  %v1080_v53 = vld [vmem:[%s1619_s4] ss:$0 sm:$0xff] }
 0x2bb   : > { %v1239_v55 = vpop.eup %1238 }
 0x2bc   : > { %v664_v56 = vmul.f32 1.442695, %v663_v54  ;;  %v440_v57 = vsel %vm386_vm2, %v1239_v55, 0.0 }
 0x2bd   : > { %441 = vadd.xlane.f32.xlu0 %v440_v57 }
 0x2be   : > { %1242 = vpow2.f32 %v664_v56 }
 0x2c1   : > { %v775_v62 = vpop.xlane.xlu1 %774 }
 0x2c2   : > { %v776_v63 = vsub.f32 %v772_v42, %v775_v62 }
 0x2c3   : > { %v1241_v58 = vpop.eup %1240 }
 0x2c4   : > { %v553_v59 = vsel %vm386_vm2, %v1241_v58, 0.0  ;;  %v777_v0 = vmul.f32 1.442695, %v776_v63 }
 0x2c5   : > { %554 = vadd.xlane.f32.xlu1 %v553_v59 }
 0x2c6   : > { %1244 = vpow2.f32 %v777_v0 }
 0x2cb   : > { %v1243_v60 = vpop.eup %1242 }
 0x2cc   : > { %v666_v61 = vsel %vm386_vm2, %v1243_v60, 0.0 }
 0x2cd   : > { %667 = vadd.xlane.f32.xlu0 %v666_v61 }
 0x2d3   : > { %v1245_v2 = vpop.eup %1244 }
 0x2d4   : > { %v779_v4 = vsel %vm386_vm2, %v1245_v2, 0.0 }
 0x2d6   : > { %561 = vrot.lane.b32.xlu1 %v1463_v9, %s1327_s24 }
 0x2e3   : > { %447 = vrot.lane.b32.xlu0 %v1463_v9, %s1328_s25  ;;  %s1332_s25 = smov 16  }
 0x2e7   : > { %787 = vrot.lane.b32.xlu0 %v1463_v9, %s1329_s26  ;;  %s1333_s26 = smov 24  }
 0x2fa   : > { %780 = vadd.xlane.f32.xlu1 %v779_v4 }
 0x30b   : > { %674 = vrot.lane.b32.xlu1 %v1463_v9, %s1330_s10  ;;  %s1256_s10 = scalar_lea.vmem %s1558_s20, 512 }
 0x30c   : > { %p1257_p11 = scmp.ne.s32.totalorder %s1558_s20, %s1256_s10 }
 0x30e   : > { %p1258_p12 = pnand %p1257_p11, %p1419_p5 }
 0x310   : > { %p1259_p13 = pneg %p1258_p12 }
 0x346   : > { %v442_v5 = vpop.xlane.xlu0 %441 }
 0x347   : > { %1246 = vrcp.f32 %v442_v5 }
 0x34e   : > { %v555_v6 = vpop.xlane.xlu1 %554 }
 0x34f   : > { %1248 = vrcp.f32 %v555_v6 }
 0x352   : > { %v562_v13 = vpop.permute.xlu1 %561 }
 0x353   : > { %v567_v16 = vsel %vm452_vm3, %v562_v13, 0 }
 0x354   : > { %v1247_v7 = vpop.eup %1246 }
 0x355   : > { %v444_v8 = vmul.f32 %v1247_v7, %v1239_v55 }
 0x356   : > { %v668_v10 = vpop.xlane.xlu0 %667 }
 0x357   : > { %1250 = vrcp.f32 %v668_v10  ;;  %445 = vst.msk [vmem:[%s1508_s17] sm:$0xff] %vm386_vm2, %v444_v8  ;;  %v446_v14 = vpack.c.bf16 %v444_v8, %v444_v8 }
 0x35a   : > { %v448_v11 = vpop.permute.xlu0 %447 }
 0x35b   : > { %v454_v9 = vsel %vm452_vm3, %v448_v11, 0 }
 0x35c   : > { %v1249_v12 = vpop.eup %1248  ;;  %1129 = vmatpush3.bf16.msra.mxu0 %v454_v9 }
 0x35d   : > { %1140 = vmatprep.subr.bf16.mxu0 %v1318_v1  ;;  %v557_v15 = vmul.f32 %v1249_v12, %v1241_v58 }
 0x35e   : > { %v788_v23 = vpop.permute.xlu0 %787 }
 0x35f   : > { %1131 = vmatmul.mubr.msk.bf16.vlgmr.msra.gmra.mxu0 %vm386_vm2, %v446_v14  ;;  %1072 = vst.msk [vmem:[%s1508_s17 + $0x8] sm:$0xff] %vm386_vm2, %v557_v15  ;;  %v560_v18 = vpack.c.bf16 %v557_v15, %v557_v15  ;;  %v793_v25 = vsel %vm452_vm3, %v788_v23, 0 }
 0x360   : > { %1141 = vmatpush3.bf16.msra.mxu0 %v567_v16  ;;  %1142 = vmatprep.mubr.msk.bf16.mxu0 %vm1319_vm0, %v1318_v1 }
 0x361   : > { %1152 = vmatprep.subr.bf16.mxu0 %v1318_v1 }
 0x364   : > { %v1251_v17 = vpop.eup %1250 }
 0x365   : > { %v670_v19 = vmul.f32 %v1251_v17, %v1243_v60 }
 0x367   : > { %1143 = vmatmul.mubr.msk.bf16.vlgmr.msra.gmra.mxu0 %vm386_vm2, %v560_v18  ;;  %1075 = vst.msk [vmem:[%s1508_s17 + $0x10] sm:$0xff] %vm386_vm2, %v670_v19  ;;  %v673_v24 = vpack.c.bf16 %v670_v19, %v670_v19 }
 0x368   : > { %1154 = vmatprep.mubr.msk.bf16.mxu0 %vm1319_vm0, %v1318_v1 }
 0x383   : > { %v781_v20 = vpop.xlane.xlu1 %780 }
 0x384   : > { %1252 = vrcp.f32 %v781_v20 }
 0x387   : > { %v675_v21 = vpop.permute.xlu1 %674 }
 0x388   : > { %v680_v22 = vsel %vm452_vm3, %v675_v21, 0 }
 0x389   : > { %1153 = vmatpush3.bf16.msra.mxu0 %v680_v22 }
 0x38a   : > { %1164 = vmatprep.subr.bf16.mxu0 %v1318_v1 }
 0x38c   : > { %1155 = vmatmul.mubr.msk.bf16.vlgmr.msra.gmra.mxu0 %vm386_vm2, %v673_v24 }
 0x38d   : > { %1165 = vmatpush3.bf16.msra.mxu0 %v793_v25  ;;  %1166 = vmatprep.mubr.msk.bf16.mxu0 %vm1319_vm0, %v1318_v1 }
 0x391   : > { %v1253_v26 = vpop.eup %1252 }
 0x392   : > { %v783_v27 = vmul.f32 %v1253_v26, %v1245_v2 }
 0x394   : > { %1078 = vst.msk [vmem:[%s1508_s17 + $0x18] sm:$0xff] %vm386_vm2, %v783_v27  ;;  %v786_v28 = vpack.c.bf16 %v783_v27, %v783_v27  ;;  %s1260_s17 = sshll.u32 %s1334_s9, 4  ;;  %s1261_s17 = int_to_ptr.vmem [resolvable:$false] %s1260_s17 }
 0x395   : > { %s1262_s13 = scalar_lea.vmem %s1261_s17, 1024  ;;  %p1263_p0 = scmp.lt.s32.totalorder %s1558_s20, %s1261_s17 }
 0x396   : > { %1167 = vmatmul.mubr.msk.bf16.vlgmr.msra.gmra.mxu0 %vm386_vm2, %v786_v28  ;;  %p1264_p1 = scmp.lt.s32.totalorder %s1262_s13, %s1256_s10 }
 0x398   : > { %p1265_p2 = por %p1264_p1, %p1263_p0 }
 0x39a   : > { %p1266_p3 = pnand %p1265_p2, %p1259_p13 }
 0x41f   : > { %v490_v29 = vpop.f32.mrf.mxu0 }
 0x421   : > { %v1132_v30 = vpop.f32.mrf.mxu0 }
 0x423   : > { %v493_v31 = vpop.f32.mrf.mxu0 }
 0x425   : > { %v1133_v32 = vpop.f32.mrf.mxu0 }
 0x427   : > { %v603_v33 = vpop.f32.mrf.mxu0 }
 0x428   : > { %836 = vrot.lane.b32.xlu1 %v603_v33, %s1331_s18 }
 0x429   : > { %v1144_v34 = vpop.f32.mrf.mxu0 }
 0x42b   : > { %v606_v35 = vpop.f32.mrf.mxu0 }
 0x42d   : > { %v1145_v36 = vpop.f32.mrf.mxu0 }
 0x44c   : > { %v716_v39 = vpop.f32.mrf.mxu0 }
 0x44d   : > { %840 = vrot.lane.b32.xlu0 %v716_v39, %s1332_s25  ;;  %s1556_s25 = scalar_lea.hbm %s1623_s8, %s1091_s19 }
 0x44e   : > { %v1156_v40 = vpop.f32.mrf.mxu0 }
 0x450   : > { %v719_v41 = vpop.f32.mrf.mxu0 }
 0x452   : > { %v1157_v42 = vpop.f32.mrf.mxu0 }
 0x456   : > { %v829_v43 = vpop.f32.mrf.mxu0 }
 0x457   : > { %844 = vrot.lane.b32.xlu1 %v829_v43, %s1333_s26  ;;  %s1562_s26 = scalar_lea.sflag [#allocation3], %s301_s12 }
 0x458   : > { %v1168_v44 = vpop.f32.mrf.mxu0 }
 0x45a   : > { %v832_v45 = vpop.f32.mrf.mxu0 }
 0x45c   : > { %v1169_v46 = vpop.f32.mrf.mxu0 }
 0x49a   : > { %v837_v47 = vpop.permute.xlu1 %836 }
 0x49b   : > { %v847_v48 = vsel %vm386_vm2, %v490_v29, %v837_v47 }
 0x4bf   : > { %v841_v1 = vpop.permute.xlu0 %840 }
 0x4c0   : > { %v849_v49 = vsel %vm848_vm4, %v847_v48, %v841_v1 }
 0x4c9   : > { %v845_v50 = vpop.permute.xlu1 %844 }
 0x4ca   : > { %v851_v51 = vsel %vm850_vm5, %v849_v49, %v845_v50 }
 0x4cb   : > { %v852_v52 = vpack.c.bf16 %v851_v51, %v851_v51 }
 0x4cd   : > { %1175 = vmatmul.mubr.msk.bf16.vlgmr.msra.gmra.mxu1 %vm338_vm1, %v852_v52 }
 0x58d   : > { %v913_v54 = vpop.f32.mrf.mxu1 }
 0x58e   : > { %v914_v55 = vadd.f32 %v1080_v53, %v913_v54 }
 0x58f   : > { %v1176_v56 = vpop.f32.mrf.mxu1 }
 0x590   : > { %v919_v57 = vadd.f32 %v914_v55, %v1453_v3 }
 0x591   : > { %v916_v58 = vpop.f32.mrf.mxu1 }
 0x592   : > { %v920_v59 = vsel %vm338_vm1, %v919_v57, 0.0 }
 0x593   : > { %921 = vadd.xlane.f32.xlu0 %v920_v59  ;;  %v1177_v60 = vpop.f32.mrf.mxu1 }
 0x61c   : > { %v922_v61 = vpop.xlane.xlu0 %921 }
 0x61d   : > { %v924_v62 = vmul.f32 0.03125, %v922_v61 }
 0x61f   : > { %v925_v63 = vsub.f32 %v919_v57, %v924_v62 }
 0x621   : > { %v926_v0 = vmul.f32 %v925_v63, %v925_v63 }
 0x623   : > { %v927_v2 = vsel %vm338_vm1, %v926_v0, 0.0 }
 0x624   : > { %928 = vadd.xlane.f32.xlu1 %v927_v2 }
 0x625   : > { %1269 = shalt.err (!%p1266_p3)
}
 0x626   : > { %s1270_s12 = scalar_lea.hbm %s1556_s25, 512  ;;  %s1274_s24 = scalar_lea.hbm %s1623_s8, 1024 }
 0x627   : > { %p1271_p4 = scmp.ne.s32.totalorder %s1556_s25, %s1270_s12  ;;  %p1275_p9 = scmp.lt.s32.totalorder %s1556_s25, %s1623_s8 }
 0x628   : > { %p1276_p10 = scmp.lt.s32.totalorder %s1274_s24, %s1270_s12 }
 0x629   : > { %p1272_p7 = pnand %p1271_p4, %p1419_p5 }
 0x62a   : > { %p1277_p11 = por %p1276_p10, %p1275_p9 }
 0x62b   : > { %p1273_p8 = pneg %p1272_p7 }
 0x62d   : > { %p1278_p12 = pnand %p1277_p11, %p1273_p8 }
 0x62f   : > { %1281 = shalt.err (!%p1278_p12)
}
 0x630   : > { %s1335_s10 = smov 128   ;;  %v1084_v7 = vld [vmem:[%s1620_s5] ss:$0 sm:$0xff]  ;;  %s1627_s15 = sshll.u32 %s1444_s21, 3 }
 0x631   : > { %1178 = dma.vmem_to_hbm [thread:$0]  (%p1419_p5), %s1558_s20, 512, %s1556_s25, %s1562_s26, %s1335_s10, %s1335_s10, %s1331_s18  }
 0x632   : > { %v1085_v10 = vld [vmem:[%s1621_s6] ss:$0 sm:$0xff]  ;;  %s311_s18 = scalar_lea.vmem %s1622_s7, %s1627_s15 }
 0x6ad   : > { %v929_v3 = vpop.xlane.xlu1 %928 }
 0x6ae   : > { %v930_v4 = vmul.f32 0.03125, %v929_v3 }
 0x6b0   : > { %v931_v5 = vadd.f32 1e-05, %v930_v4 }
 0x6b2   : > { %1254 = vrsqrt.f32 %v931_v5 }
 0x6bf   : > { %v1255_v6 = vpop.eup %1254 }
 0x6c0   : > { %v933_v8 = vmul.f32 %v1255_v6, %v925_v63 }
 0x6c2   : > { %v941_v11 = vmul.f32 %v1084_v7, %v933_v8 }
 0x6c4   : > { %v949_v9 = vadd.f32 %v1085_v10, %v941_v11 }
 0x6c6   : > { %950 = vst.msk [vmem:[%s311_s18] sm:$0xff] %vm338_vm1, %v949_v9 }
 0x6c7 PF: > { %p1184_p5 = scmp.ge.s32.totalorder %s1316_s30, 2  ;;  %s994_s20 = sand.u32 1, %s1304_s27  }
 0x6c8   : > { %s995_s25 = scalar_lea.sflag [#allocation3], %s994_s20 }
 0x6c9   : > { %p1181_p13 = pnand %p1184_p5, %p1423_p6 }
 0x6cb   : > { %p1182_p0 = pneg %p1181_p13 }
 0x6cd   : > { %1299 = dma.done.wait (%p1182_p0), %s995_s25, 512  }
 0x6ce   : > { %1301 = vsyncadd (%p1182_p0), %s995_s25, 4294966784  ;;  %p19_p1 = scmp.ge.s32.totalorder %s1406_s11, 4   ;;  %s1628_s27 = smov %s1308_s28 }
 0x6cf   : > { %s1629_s28 = smov %s1312_s29  ;;  %s1630_s29 = smov %s1417_s14 }
 0x6d0   : > { %s1631_s30 = smov %s1406_s11  ;;  %21 = sbr.rel (!%p19_p1) target bundleno = 3 (0x3), region = 98 }
 0x6d5   :  { %1000 = vsyncpa [#allocation3], 1 }
 0x6d6   :  { %1002 = vsyncpa [#allocation3 + $0x1], 1 }

</bundles_post_ra>
